<compile_context>
chip_gen: v5e
topology: v5e:2x2
jax: 0.10.0
libtpu: 0.0.40
codegen_flags: <defaults>
</compile_context>

<pallas_src>
import functools
import math

import jax
import jax.numpy as jnp
from jax.experimental import pallas as pl
from jax.experimental.pallas import tpu as pltpu

LANE = 128
SUBLANE = 8


def _round_up(n, m):
    return ((n + m - 1) // m) * m


def _vmem_capacity_bytes():
    try:
        return int(pltpu.get_tpu_info().vmem_capacity_bytes)
    except Exception:
        return 64 * 1024 * 1024  # conservative (v7x per-TC VMEM)


def _resident_spec(shape):
    """Whole-array block, constant index map, single-buffered (stays VMEM-resident)."""
    ndim = len(shape)
    index_map = lambda i: (0,) * ndim
    if hasattr(pl, "Buffered"):
        return pl.BlockSpec(shape, index_map, pipeline_mode=pl.Buffered(1))
    return pl.BlockSpec(shape, index_map)


def mlp_kernel(x_ref, w1_ref, b1_ref, w2_ref, b2_ref, w3_ref, b3_ref, o_ref):
    dot_dtype = w1_ref.dtype          # bf16 (default) or f32 MXU operands
    x = x_ref[...].astype(dot_dtype)  # in-kernel cast rides the VPU slot (free)
    # Layer 1: Linear + bias + ReLU (bias/ReLU in f32 on the VPU).
    h = jnp.dot(x, w1_ref[...], preferred_element_type=jnp.float32)
    h = jnp.maximum(h + b1_ref[...], 0.0)
    # Layer 2: Linear + bias + ReLU.
    h = jnp.dot(h.astype(dot_dtype), w2_ref[...],
                preferred_element_type=jnp.float32)
    h = jnp.maximum(h + b2_ref[...], 0.0)
    # Layer 3: Linear + bias (no activation).
    h = jnp.dot(h.astype(dot_dtype), w3_ref[...],
                preferred_element_type=jnp.float32)
    h = h + b3_ref[...]
    o_ref[...] = h.astype(o_ref.dtype)
    # TODO(synk): the PyTorch forward prints a message when NaNs appear; this
    # debug-print side effect is omitted (it does not change returned values).


@functools.partial(jax.jit,
                   static_argnames=("batch_tile", "compute_dtype", "out_dtype"))
def mlp_forward(x, params, *, batch_tile=512, compute_dtype=jnp.bfloat16,
                out_dtype=None):
    if out_dtype is None:
        out_dtype = compute_dtype
    w1, b1, w2, b2, w3, b3 = params
    B, in_dim = x.shape
    hid_dim = w1.shape[1]
    out_dim = w3.shape[1]

    # Lane-align feature dims (zero padding keeps the math exact).
    in_p = _round_up(in_dim, LANE)
    hid_p = _round_up(hid_dim, LANE)
    out_p = _round_up(out_dim, LANE)

    # Batch tile: sublane-aligned; the ragged last tile is handled by Pallas
    # with masked stores, so the batch is never padded in HBM.
    TB = max(SUBLANE, min(_round_up(batch_tile, SUBLANE), _round_up(B, SUBLANE)))
    # v7x megacore: make sure the "parallel" batch axis has >= 2 grid steps
    # whenever the batch is large enough, so both TensorCores get work.
    if pl.cdiv(B, TB) < 2 and B > SUBLANE:
        TB = _round_up(pl.cdiv(B, 2), SUBLANE)

    # Generation-aware VMEM budget (leave headroom for Mosaic internal scratch).
    cap = _vmem_capacity_bytes()
    budget = cap - max(8 << 20, cap // 8)   # ~56 MiB on v7x, ~112 MiB on v5e/v6e
    weight_bufs = 1 if hasattr(pl, "Buffered") else 2
    w_item = jnp.dtype(compute_dtype).itemsize
    x_item = jnp.dtype(x.dtype).itemsize if in_dim == in_p else w_item
    o_item = jnp.dtype(out_dtype).itemsize

    def _vmem_estimate(tb):
        return (2 * tb * (in_p * x_item + out_p * o_item)            # x / out tiles (double-buffered)
                + weight_bufs * ((in_p * hid_p + hid_p * hid_p
                                  + hid_p * out_p) * w_item
                                 + (2 * hid_p + out_p) * 4)          # resident weights + f32 biases
                + 3 * tb * hid_p * 4)                                # f32 intermediates

    while _vmem_estimate(TB) > budget and TB > 4 * SUBLANE:
        TB = max(4 * SUBLANE, _round_up(TB // 2, SUBLANE))

    num_tiles = pl.cdiv(B, TB)
    vmem_limit = int(min(max(2 * _vmem_estimate(TB), 32 << 20), budget))

    # Only pad / cast what is actually needed (avoid extra HBM copies of x).
    if in_dim == in_p:
        xp = x   # passed through untouched; kernel casts tiles on the fly
    else:
        xp = jnp.pad(x, ((0, 0), (0, in_p - in_dim))).astype(compute_dtype)

    pad2 = lambda a, r, c: a if a.shape == (r, c) else jnp.pad(
        a, ((0, r - a.shape[0]), (0, c - a.shape[1])))
    w1p = pad2(w1, in_p, hid_p).astype(compute_dtype)
    w2p = pad2(w2, hid_p, hid_p).astype(compute_dtype)
    w3p = pad2(w3, hid_p, out_p).astype(compute_dtype)
    b1p = pad2(b1, 1, hid_p).astype(jnp.float32)   # biases added in f32 (VPU)
    b2p = pad2(b2, 1, hid_p).astype(jnp.float32)
    b3p = pad2(b3, 1, out_p).astype(jnp.float32)

    out = pl.pallas_call(
        mlp_kernel,
        out_shape=jax.ShapeDtypeStruct((B, out_p), out_dtype),
        grid_spec=pltpu.PrefetchScalarGridSpec(
            num_scalar_prefetch=0,
            grid=(num_tiles,),
            in_specs=[
                pl.BlockSpec((TB, in_p), lambda i: (i, 0)),   # x tiled over batch
                _resident_spec(w1p.shape), _resident_spec(b1p.shape),
                _resident_spec(w2p.shape), _resident_spec(b2p.shape),
                _resident_spec(w3p.shape), _resident_spec(b3p.shape),
            ],
            out_specs=pl.BlockSpec((TB, out_p), lambda i: (i, 0)),
        ),
        compiler_params=pltpu.CompilerParams(
            dimension_semantics=("parallel",),
            vmem_limit_bytes=vmem_limit,
        ),
    )(xp, w1p, b1p, w2p, b2p, w3p, b3p)

    return out if out_dim == out_p else out[:, :out_dim]


def mlp_reference(x, params, compute_dtype=jnp.float32):
    # Plain-JAX reference with the same cast points as the kernel.
    w1, b1, w2, b2, w3, b3 = params
    c = lambda a: a.astype(compute_dtype)
    h = jnp.dot(c(x), c(w1), preferred_element_type=jnp.float32) + b1
    h = jnp.maximum(h, 0.0)
    h = jnp.dot(c(h), c(w2), preferred_element_type=jnp.float32) + b2
    h = jnp.maximum(h, 0.0)
    h = jnp.dot(c(h), c(w3), preferred_element_type=jnp.float32) + b3
    return h


def xavier_uniform(key, fan_in, fan_out):
    # Matches torch.nn.init.xavier_uniform_ (gain=1); stored [in, out] so the
    # kernel computes x @ W.
    bound = math.sqrt(6.0 / (fan_in + fan_out))
    return jax.random.uniform(key, (fan_in, fan_out), jnp.float32,
                              minval=-bound, maxval=bound)


def init_mlp_params(key, input_dim, hidden_dim, output_dim):
    k1, k2, k3 = jax.random.split(key, 3)
    w1 = xavier_uniform(k1, input_dim, hidden_dim)
    w2 = xavier_uniform(k2, hidden_dim, hidden_dim)
    w3 = xavier_uniform(k3, hidden_dim, output_dim)
    b1 = jnp.full((1, hidden_dim), 0.01, jnp.float32)
    b2 = jnp.full((1, hidden_dim), 0.01, jnp.float32)
    b3 = jnp.full((1, output_dim), 0.01, jnp.float32)
    return (w1, b1, w2, b2, w3, b3)


if __name__ == "__main__":
    key = jax.random.PRNGKey(0)
    k_x, k_p = jax.random.split(key)

    batch, input_dim, hidden_dim, output_dim = 8, 16, 32, 8
    x = jax.random.normal(k_x, (batch, input_dim), jnp.float32)
    params = init_mlp_params(k_p, input_dim, hidden_dim, output_dim)

    ref = mlp_reference(x, params)

    # Default path: bf16 MXU operands, f32 accumulation, bf16 output.
    out_bf = jax.block_until_ready(mlp_forward(x, params))
    assert out_bf.shape == (batch, output_dim)
    err_bf = float(jnp.max(jnp.abs(out_bf.astype(jnp.float32) - ref)))
    assert jnp.allclose(out_bf.astype(jnp.float32), ref,
                        atol=5e-2, rtol=5e-2), err_bf

    # f32 path: matches the f32 PyTorch module's semantics tightly.
    out_f32 = jax.block_until_ready(
        mlp_forward(x, params, compute_dtype=jnp.float32,
                    out_dtype=jnp.float32))
    err_f32 = float(jnp.max(jnp.abs(out_f32 - ref)))
    assert jnp.allclose(out_f32, ref, atol=1e-5, rtol=1e-5), err_f32

    print("KERNEL_OK")
</pallas_src>

<mosaic_0001>
module attributes {stable_mosaic.version = 11 : i64} {
  func.func @mlp_kernel(%arg0: i32, %arg1: memref<8x128xbf16, #tpu.memory_space<vmem>>, %arg2: memref<128x128xbf16, #tpu.memory_space<vmem>>, %arg3: memref<1x128xf32, #tpu.memory_space<vmem>>, %arg4: memref<128x128xbf16, #tpu.memory_space<vmem>>, %arg5: memref<1x128xf32, #tpu.memory_space<vmem>>, %arg6: memref<128x128xbf16, #tpu.memory_space<vmem>>, %arg7: memref<1x128xf32, #tpu.memory_space<vmem>>, %arg8: memref<8x128xbf16, #tpu.memory_space<vmem>>) attributes {dimension_semantics = [#tpu.dimension_semantics<parallel>], iteration_bounds = array<i64: 1>, scalar_prefetch = 0 : i64, scratch_operands = 0 : i64, tpu.core_type = #tpu.core_type<tc>, window_params = [{transform_indices = @transform_0, window_bounds = array<i64: 8, 128>}, {pipeline_mode = #tpu.pipeline_mode<synchronous>, transform_indices = @transform_1, window_bounds = array<i64: 128, 128>}, {pipeline_mode = #tpu.pipeline_mode<synchronous>, transform_indices = @transform_2, window_bounds = array<i64: 1, 128>}, {pipeline_mode = #tpu.pipeline_mode<synchronous>, transform_indices = @transform_3, window_bounds = array<i64: 128, 128>}, {pipeline_mode = #tpu.pipeline_mode<synchronous>, transform_indices = @transform_4, window_bounds = array<i64: 1, 128>}, {pipeline_mode = #tpu.pipeline_mode<synchronous>, transform_indices = @transform_5, window_bounds = array<i64: 128, 128>}, {pipeline_mode = #tpu.pipeline_mode<synchronous>, transform_indices = @transform_6, window_bounds = array<i64: 1, 128>}, {transform_indices = @transform_7, window_bounds = array<i64: 8, 128>}]} {
    %c0 = arith.constant 0 : index
    %c0_0 = arith.constant 0 : index
    %0 = vector.load %arg1[%c0, %c0_0] : memref<8x128xbf16, #tpu.memory_space<vmem>>, vector<8x128xbf16>
    %c0_1 = arith.constant 0 : index
    %c0_2 = arith.constant 0 : index
    %1 = vector.load %arg2[%c0_1, %c0_2] : memref<128x128xbf16, #tpu.memory_space<vmem>>, vector<128x128xbf16>
    %cst = arith.constant dense<0.000000e+00> : vector<8x128xf32>
    %2 = tpu.matmul %0, %1, %cst {dimension_numbers = #tpu.dot_dimension_numbers<[1], [0], [0], [1], [0, 0, 1, 1], [], []>} : vector<8x128xbf16>, vector<128x128xbf16>, vector<8x128xf32> -> vector<8x128xf32>
    %c0_3 = arith.constant 0 : index
    %c0_4 = arith.constant 0 : index
    %3 = vector.load %arg3[%c0_3, %c0_4] : memref<1x128xf32, #tpu.memory_space<vmem>>, vector<1x128xf32>
    %4 = vector.broadcast %3 : vector<1x128xf32> to vector<8x128xf32>
    %5 = arith.addf %2, %4 : vector<8x128xf32>
    %cst_5 = arith.constant 0.000000e+00 : f32
    %6 = vector.broadcast %cst_5 : f32 to vector<8x128xf32>
    %7 = arith.maximumf %5, %6 : vector<8x128xf32>
    %8 = arith.truncf %7 : vector<8x128xf32> to vector<8x128xbf16>
    %c0_6 = arith.constant 0 : index
    %c0_7 = arith.constant 0 : index
    %9 = vector.load %arg4[%c0_6, %c0_7] : memref<128x128xbf16, #tpu.memory_space<vmem>>, vector<128x128xbf16>
    %cst_8 = arith.constant dense<0.000000e+00> : vector<8x128xf32>
    %10 = tpu.matmul %8, %9, %cst_8 {dimension_numbers = #tpu.dot_dimension_numbers<[1], [0], [0], [1], [0, 0, 1, 1], [], []>} : vector<8x128xbf16>, vector<128x128xbf16>, vector<8x128xf32> -> vector<8x128xf32>
    %c0_9 = arith.constant 0 : index
    %c0_10 = arith.constant 0 : index
    %11 = vector.load %arg5[%c0_9, %c0_10] : memref<1x128xf32, #tpu.memory_space<vmem>>, vector<1x128xf32>
    %12 = vector.broadcast %11 : vector<1x128xf32> to vector<8x128xf32>
    %13 = arith.addf %10, %12 : vector<8x128xf32>
    %cst_11 = arith.constant 0.000000e+00 : f32
    %14 = vector.broadcast %cst_11 : f32 to vector<8x128xf32>
    %15 = arith.maximumf %13, %14 : vector<8x128xf32>
    %16 = arith.truncf %15 : vector<8x128xf32> to vector<8x128xbf16>
    %c0_12 = arith.constant 0 : index
    %c0_13 = arith.constant 0 : index
    %17 = vector.load %arg6[%c0_12, %c0_13] : memref<128x128xbf16, #tpu.memory_space<vmem>>, vector<128x128xbf16>
    %cst_14 = arith.constant dense<0.000000e+00> : vector<8x128xf32>
    %18 = tpu.matmul %16, %17, %cst_14 {dimension_numbers = #tpu.dot_dimension_numbers<[1], [0], [0], [1], [0, 0, 1, 1], [], []>} : vector<8x128xbf16>, vector<128x128xbf16>, vector<8x128xf32> -> vector<8x128xf32>
    %c0_15 = arith.constant 0 : index
    %c0_16 = arith.constant 0 : index
    %19 = vector.load %arg7[%c0_15, %c0_16] : memref<1x128xf32, #tpu.memory_space<vmem>>, vector<1x128xf32>
    %20 = vector.broadcast %19 : vector<1x128xf32> to vector<8x128xf32>
    %21 = arith.addf %18, %20 : vector<8x128xf32>
    %22 = arith.truncf %21 : vector<8x128xf32> to vector<8x128xbf16>
    %c0_17 = arith.constant 0 : index
    %c0_18 = arith.constant 0 : index
    %23 = vector.load %arg8[%c0_17, %c0_18] : memref<8x128xbf16, #tpu.memory_space<vmem>>, vector<8x128xbf16>
    tpu.vector_store %arg8[%c0_17, %c0_18], %22 {strides = array<i32>} : memref<8x128xbf16, #tpu.memory_space<vmem>>, vector<8x128xbf16>,
    return
  }
  func.func @transform_0(%arg0: i32) -> (i32, i32) {
    %c0_i32 = arith.constant 0 : i32
    %c0_i32_0 = arith.constant 0 : i32
    return %arg0, %c0_i32 : i32, i32
  }
  func.func @transform_1(%arg0: i32) -> (i32, i32) {
    %c0_i32 = arith.constant 0 : i32
    %c0_i32_0 = arith.constant 0 : i32
    %c0_i32_1 = arith.constant 0 : i32
    return %c0_i32, %c0_i32_0 : i32, i32
  }
  func.func @transform_2(%arg0: i32) -> (i32, i32) {
    %c0_i32 = arith.constant 0 : i32
    %c0_i32_0 = arith.constant 0 : i32
    %c0_i32_1 = arith.constant 0 : i32
    return %c0_i32, %c0_i32_0 : i32, i32
  }
  func.func @transform_3(%arg0: i32) -> (i32, i32) {
    %c0_i32 = arith.constant 0 : i32
    %c0_i32_0 = arith.constant 0 : i32
    %c0_i32_1 = arith.constant 0 : i32
    return %c0_i32, %c0_i32_0 : i32, i32
  }
  func.func @transform_4(%arg0: i32) -> (i32, i32) {
    %c0_i32 = arith.constant 0 : i32
    %c0_i32_0 = arith.constant 0 : i32
    %c0_i32_1 = arith.constant 0 : i32
    return %c0_i32, %c0_i32_0 : i32, i32
  }
  func.func @transform_5(%arg0: i32) -> (i32, i32) {
    %c0_i32 = arith.constant 0 : i32
    %c0_i32_0 = arith.constant 0 : i32
    %c0_i32_1 = arith.constant 0 : i32
    return %c0_i32, %c0_i32_0 : i32, i32
  }
  func.func @transform_6(%arg0: i32) -> (i32, i32) {
    %c0_i32 = arith.constant 0 : i32
    %c0_i32_0 = arith.constant 0 : i32
    %c0_i32_1 = arith.constant 0 : i32
    return %c0_i32, %c0_i32_0 : i32, i32
  }
  func.func @transform_7(%arg0: i32) -> (i32, i32) {
    %c0_i32 = arith.constant 0 : i32
    %c0_i32_0 = arith.constant 0 : i32
    return %arg0, %c0_i32 : i32, i32
  }
}

</mosaic_0001>

<bundles_post_ra>
// kernel: mlp_forward.1
= control target key start
LH: loop header
LB: loop body
LE: loop exit
PB: predicated region body
PF: predicated region fallthrough
CT: control target
= control target key end

     0   :  { %s571_s0 = inlined_call_operand.vmem [shape: bf16[8,128], index: 0, kind: input, shape index: {}]   ;;  %s572_s1 = inlined_call_operand.vmem [shape: bf16[128,128], index: 1, kind: input, shape index: {}]   ;;  %s573_s2 = inlined_call_operand.vmem [shape: f32[1,128], index: 2, kind: input, shape index: {}]   ;;  %s574_s3 = inlined_call_operand.vmem [shape: bf16[128,128], index: 3, kind: input, shape index: {}]   ;;  %s575_s4 = inlined_call_operand.vmem [shape: f32[1,128], index: 4, kind: input, shape index: {}]   ;;  %s576_s5 = inlined_call_operand.vmem [shape: bf16[128,128], index: 5, kind: input, shape index: {}]   ;;  %s577_s6 = inlined_call_operand.vmem [shape: f32[1,128], index: 6, kind: input, shape index: {}]   ;;  %s578_s7 = inlined_call_operand.hbm [shape: bf16[8,128], index: 7, kind: output, shape index: {}]  }
   0x1   :  { %v396_v0 = vld [vmem:[%s572_s1 + $0x38] sm:$0xff]  ;;  %v395_v1 = vld [vmem:[%s572_s1 + $0x30] sm:$0xff]  ;;  %v394_v4 = vld [vmem:[%s572_s1 + $0x28] sm:$0xff] }
   0x2   :  { %96 = vmatpush.bf16.msra.mxu0 %v396_v0  ;;  %v404_v2 = vld [vmem:[%s574_s3 + $0x38] sm:$0xff]  ;;  %v403_v3 = vld [vmem:[%s574_s3 + $0x30] sm:$0xff] }
   0x3   :  { %179 = vmatpush.bf16.msra.mxu1 %v404_v2 }
   0x6   :  { %97 = vmatpush.bf16.msra.mxu0 %v395_v1 }
   0x7   :  { %12 = vsyncpa [#allocation3], 0  ;;  %180 = vmatpush.bf16.msra.mxu1 %v403_v3  ;;  %v402_v5 = vld [vmem:[%s574_s3 + $0x28] sm:$0xff]  ;;  %v393_v6 = vld [vmem:[%s572_s1 + $0x20] sm:$0xff]  ;;  %s443_s30 = smov [#allocation2]   ;;  %s284_s10 = sshll.u32 %s578_s7, 4  ;;  %s285_s10 = int_to_ptr.hbm [resolvable:$true] %s284_s10 }
   0x8   :  { %v401_v7 = vld [vmem:[%s574_s3 + $0x20] sm:$0xff]  ;;  %v392_v8 = vld [vmem:[%s572_s1 + $0x18] sm:$0xff]  ;;  %v391_v10 = vld [vmem:[%s572_s1 + $0x10] sm:$0xff]  ;;  %s282_s8 = sshll.u32 %s443_s30, 4  ;;  %s283_s8 = int_to_ptr.vmem [resolvable:$true] %s282_s8 }
   0x9   :  { %v400_v9 = vld [vmem:[%s574_s3 + $0x18] sm:$0xff]  ;;  %v399_v11 = vld [vmem:[%s574_s3 + $0x10] sm:$0xff]  ;;  %v390_v12 = vld [vmem:[%s572_s1 + $0x8] sm:$0xff] }
   0xa   :  { %98 = vmatpush.bf16.msra.mxu0 %v394_v4  ;;  %v389_v13 = vld [vmem:[%s572_s1] sm:$0xff]  ;;  %v398_v15 = vld [vmem:[%s574_s3 + $0x8] sm:$0xff]  ;;  %v412_v17 = vld [vmem:[%s576_s5 + $0x38] sm:$0xff] }
   0xb   :  { %181 = vmatpush.bf16.msra.mxu1 %v402_v5  ;;  %v27_v14 = vld [vmem:[%s571_s0] sm:$0xf]  ;;  %262 = vmatpush.bf16.msra.mxu2 %v412_v17  ;;  %v411_v18 = vld [vmem:[%s576_s5 + $0x30] sm:$0xff]  ;;  %v410_v19 = vld [vmem:[%s576_s5 + $0x28] sm:$0xff] }
   0xc   :  { %v397_v16 = vld [vmem:[%s574_s3] sm:$0xff]  ;;  %v408_v21 = vld [vmem:[%s576_s5 + $0x18] sm:$0xff]  ;;  %v407_v22 = vld [vmem:[%s576_s5 + $0x10] sm:$0xff] }
   0xd   :  { %v409_v20 = vld [vmem:[%s576_s5 + $0x20] sm:$0xff]  ;;  %v406_v29 = vld [vmem:[%s576_s5 + $0x8] sm:$0xff] }
   0xe   :  { %99 = vmatpush.bf16.msra.mxu0 %v393_v6  ;;  %v414_v23 = vld [vmem:[%s573_s2] ss:$0 sm:$0xff] }
   0xf   :  { %182 = vmatpush.bf16.msra.mxu1 %v401_v7  ;;  %263 = vmatpush.bf16.msra.mxu2 %v411_v18  ;;  %v405_v30 = vld [vmem:[%s576_s5] sm:$0xff] }
  0x10   :  { %v415_v31 = vld [vmem:[%s575_s4] ss:$0 sm:$0xff] }
  0x11   :  { %v416_v37 = vld [vmem:[%s577_s6] ss:$0 sm:$0xff] }
  0x12   :  { %100 = vmatpush.bf16.msra.mxu0 %v392_v8 }
  0x13   :  { %183 = vmatpush.bf16.msra.mxu1 %v400_v9  ;;  %264 = vmatpush.bf16.msra.mxu2 %v410_v19 }
  0x16   :  { %101 = vmatpush.bf16.msra.mxu0 %v391_v10 }
  0x17   :  { %184 = vmatpush.bf16.msra.mxu1 %v399_v11  ;;  %265 = vmatpush.bf16.msra.mxu2 %v409_v20 }
  0x1a   :  { %102 = vmatpush.bf16.msra.mxu0 %v390_v12 }
  0x1b   :  { %185 = vmatpush.bf16.msra.mxu1 %v398_v15  ;;  %266 = vmatpush.bf16.msra.mxu2 %v408_v21 }
  0x1e   :  { %103 = vmatpush.bf16.msra.mxu0 %v389_v13 }
  0x1f   :  { %186 = vmatpush.bf16.msra.mxu1 %v397_v16  ;;  %267 = vmatpush.bf16.msra.mxu2 %v407_v22 }
  0x21   :  { %104 = vmatmul.bf16.vlgmr.msra.gmra.mxu0 %v27_v14 }
  0x23   :  { %268 = vmatpush.bf16.msra.mxu2 %v406_v29 }
  0x27   :  { %269 = vmatpush.bf16.msra.mxu2 %v405_v30 }
  0x9e   :  { %v105_v24 = vpop.f32.mrf.mxu0 }
  0x9f   :  { %v106_v25 = vadd.f32 %v414_v23, %v105_v24 }
  0xa1   :  { %v109_v26 = vmax.f32 %v106_v25, 0.0 }
  0xa3   :  { %v110_v27 = vpack.c.bf16 %v109_v26, %v109_v26 }
  0xa5   :  { %187 = vmatmul.bf16.vlgmr.msra.gmra.mxu1 %v110_v27 }
  0xa6   :  { %v107_v28 = vpop.f32.mrf.mxu0 }
 0x122   :  { %v188_v32 = vpop.f32.mrf.mxu1 }
 0x123   :  { %v189_v33 = vadd.f32 %v415_v31, %v188_v32 }
 0x125   :  { %v192_v34 = vmax.f32 %v189_v33, 0.0 }
 0x127   :  { %v193_v35 = vpack.c.bf16 %v192_v34, %v192_v34 }
 0x129   :  { %270 = vmatmul.bf16.vlgmr.msra.gmra.mxu2 %v193_v35 }
 0x12a   :  { %v190_v36 = vpop.f32.mrf.mxu1 }
 0x1ac   :  { %v271_v38 = vpop.f32.mrf.mxu2 }
 0x1ad   :  { %v272_v39 = vadd.f32 %v416_v37, %v271_v38 }
 0x1af   :  { %v275_v40 = vpack.c.bf16 %v272_v39, %v272_v39 }
 0x1b1   :  { %276 = vst [vmem:[#allocation2] sm:$0xf] %v275_v40 }
 0x1b2   :  { %287 = dma.vmem_to_hbm [thread:$0]  %s283_s8, 64, %s285_s10, [#allocation3]  }
 0x1b4   :  { %v273_v41 = vpop.f32.mrf.mxu2 }
 0x1b5   :  { %441 = dma.done.wait [#allocation3], 64  }
 0x1b6   :  { %442 = vsyncadd [#allocation3], 4294967232 }
 0x1b7   :  { %292 = vsyncpa [#allocation3], 1 }

</bundles_post_ra>
